<compile_context>
chip_gen: v7x
topology: tpu7x:2x2x1
jax: 0.10.0
libtpu: 0.0.40
codegen_flags: <defaults>
</compile_context>

<pallas_src>
import functools

import jax
import jax.numpy as jnp
import numpy as np
from jax.experimental import pallas as pl
from jax.experimental.pallas import tpu as pltpu

EPS = 1e-5                    # nn.BatchNorm1d default eps
MATMUL_DTYPE = jnp.bfloat16   # MXU operand dtype (jnp.float32 => bit-faithful)
_HALO = 8                     # leading zero rows per batch segment (>= pad, 8-aligned)


def _round_up(v, m):
    return (v + m - 1) // m * m


def _geometry(N, L, K):
    """Row layout of the flat padded buffer."""
    pad = K // 2
    assert pad <= _HALO, "kernel sizes up to 17 supported"
    S = _round_up(_HALO + L + pad, 8)          # per-batch row stride
    Mp = _round_up((N - 1) * S + L, 8)         # conv-output rows (valid + halo)
    T = _round_up(Mp + _HALO + pad, 8)         # total buffer rows
    return pad, S, Mp, T


def _make_kernel(K, N, L, C, S, Mp, T):
    pad = K // 2
    H = _HALO
    inv_M = 1.0 / float(N * L)                 # BN averages over real rows only

    def kernel(x_ref, mask_ref, w1_ref, g2_ref, be2_ref, w2_ref, g3_ref,
               be3_ref, o_ref, buf_ref):
        # ---- zero only the halo rows of the shared padded buffer -----------
        buf_ref[0:H, :] = jnp.zeros((H, C), jnp.float32)
        for n in range(N):
            lo = n * S + H + L
            hi = (n + 1) * S + H if n + 1 < N else T
            if hi > lo:
                buf_ref[lo:hi, :] = jnp.zeros((hi - lo, C), jnp.float32)

        # ---- scatter x into its 8-aligned per-batch slot --------------------
        for n in range(N):
            buf_ref[n * S + H:n * S + H + L, :] = x_ref[n, :, :]

        mask = mask_ref[...]                   # (Mp, 1): 1.0 real row, 0.0 halo row

        def conv(w_ref):
            # Each tap is a contiguous 2-D window of the flat buffer => one
            # (Mp, C) @ (C, C) bf16 MXU matmul, accumulated in f32.  The conv
            # bias is omitted: a per-channel constant cancels exactly in the
            # following batch-norm (mean subtraction).
            acc = jnp.dot(
                buf_ref[H - pad:H - pad + Mp, :].astype(MATMUL_DTYPE),
                w_ref[0], preferred_element_type=jnp.float32)
            for k in range(1, K):
                acc = acc + jnp.dot(
                    buf_ref[H - pad + k:H - pad + k + Mp, :].astype(MATMUL_DTYPE),
                    w_ref[k], preferred_element_type=jnp.float32)
            return acc                          # (Mp, C) f32; halo rows = garbage

        def bn_relu(y, g_ref, be_ref):
            # training-mode batch stats over the N*L real rows (two-pass var)
            y = y * mask
            mean = jnp.sum(y, axis=0, keepdims=True) * inv_M
            d = (y - mean) * mask
            var = jnp.sum(d * d, axis=0, keepdims=True) * inv_M
            scale = jax.lax.rsqrt(var + EPS) * g_ref[...]
            return jnp.maximum(d * scale + be_ref[...], 0.0)

        # ---- conv1 -> bn2 -> relu -------------------------------------------
        h1 = bn_relu(conv(w1_ref), g2_ref, be2_ref)
        # reuse the padded buffer as conv2's input; halo rows forced back to 0
        buf_ref[H:H + Mp, :] = h1 * mask

        # ---- conv2 -> bn3 -> relu -------------------------------------------
        h2 = bn_relu(conv(w2_ref), g3_ref, be3_ref)

        # ---- residual add (x re-read from its VMEM-resident ref) ------------
        for n in range(N):
            o_ref[n, :, :] = h2[n * S:n * S + L, :] + x_ref[n, :, :]

    return kernel


def res_block_up_nlc(x_nlc, params, kernel_size):
    """Fused res_block_up forward.  x_nlc: (N, L, C) channels-last."""
    K = int(kernel_size)
    assert K % 2 == 1, "padding=K//2 keeps the length only for odd kernel sizes"
    N, L, C = x_nlc.shape
    assert params["w2"].shape[0] == C, "residual add requires inp == out"
    pad, S, Mp, T = _geometry(N, L, K)

    x = x_nlc.astype(jnp.float32)

    # PyTorch Conv1d weight (Cout, Cin, K) -> per-tap (K, Cin, Cout), bf16.
    w1 = jnp.transpose(params["w1"], (2, 1, 0)).astype(MATMUL_DTYPE)
    w2 = jnp.transpose(params["w2"], (2, 1, 0)).astype(MATMUL_DTYPE)
    row = lambda v: v.reshape(1, -1).astype(jnp.float32)

    # 0/1 mask over conv-output rows (static, built host-side).
    mask = jnp.asarray(((np.arange(Mp) % S) < L).astype(np.float32).reshape(Mp, 1))

    vmem = pl.BlockSpec(memory_space=pltpu.MemorySpace.VMEM)
    vmem_bytes = 4 * C * (T + 4 * N * L + 8 * Mp) + 4 * K * C * C + (64 << 10)
    vmem_limit = int(min(max(2 * vmem_bytes, 8 << 20), 64 << 20))

    return pl.pallas_call(
        _make_kernel(K, N, L, C, S, Mp, T),
        out_shape=jax.ShapeDtypeStruct((N, L, C), jnp.float32),
        in_specs=[vmem] * 8,
        out_specs=vmem,
        scratch_shapes=[pltpu.VMEM((T, C), jnp.float32)],   # shared padded buffer
        input_output_aliases={0: 0},                        # output reuses x's HBM buffer
        compiler_params=pltpu.CompilerParams(vmem_limit_bytes=vmem_limit),
    )(x, mask, w1, row(params["g2"]), row(params["be2"]),
      w2, row(params["g3"]), row(params["be3"]))


def res_block_up_forward(x_ncl, params, kernel_size):
    """PyTorch-layout adapter (N, C, L).  A real decoder should stay
    channels-last between blocks and call res_block_up_nlc directly, so these
    full-activation transposes happen only once at the network boundary."""
    out = res_block_up_nlc(jnp.transpose(x_ncl, (0, 2, 1)), params, kernel_size)
    return jnp.transpose(out, (0, 2, 1))


def _reference_nlc(x, params, K):
    """Pure-JAX reference of the same forward pass (channels-last math).
    Uses the same MXU operand dtype as the kernel so the comparison isolates
    kernel structure; with MATMUL_DTYPE = jnp.float32 it is the exact f32
    PyTorch forward (including the conv biases, which cancel in the BN)."""
    pad = K // 2
    x = x.astype(jnp.float32)
    L = x.shape[1]

    def conv(src, w, b):
        sp = jnp.pad(src.astype(MATMUL_DTYPE), ((0, 0), (pad, pad), (0, 0)))
        wt = jnp.transpose(w, (2, 1, 0)).astype(MATMUL_DTYPE)
        y = sum(jax.lax.dot_general(sp[:, k:k + L, :], wt[k],
                                    (((2,), (0,)), ((), ())),
                                    preferred_element_type=jnp.float32)
                for k in range(K))
        return y + b.reshape(1, 1, -1).astype(jnp.float32)

    def bn_relu(y, g, be):
        m = y.mean(axis=(0, 1), keepdims=True)
        v = ((y - m) ** 2).mean(axis=(0, 1), keepdims=True)
        return jnp.maximum((y - m) * jax.lax.rsqrt(v + EPS) * g.reshape(1, 1, -1)
                           + be.reshape(1, 1, -1), 0.0)

    h = bn_relu(conv(x, params["w1"], params["b1"]), params["g2"], params["be2"])
    h2 = bn_relu(conv(h, params["w2"], params["b2"]), params["g3"], params["be3"])
    return h2 + x


if __name__ == "__main__":
    # Decoder instantiates res_block_up(c_m=128, c_m=128, kernel, stride=[1]);
    # use the real channel count (lane-dense C=128) with a small batch/length.
    N, C, L, K = 2, 128, 16, 3
    key = jax.random.PRNGKey(0)
    ks = jax.random.split(key, 9)
    x = jax.random.normal(ks[0], (N, L, C), jnp.float32)             # channels-last
    params = dict(
        w1=0.1 * jax.random.normal(ks[1], (C, C, K), jnp.float32),   # conv1.weight
        b1=0.1 * jax.random.normal(ks[2], (C,), jnp.float32),        # conv1.bias
        g2=1.0 + 0.1 * jax.random.normal(ks[3], (C,), jnp.float32),  # bn2.weight
        be2=0.1 * jax.random.normal(ks[4], (C,), jnp.float32),       # bn2.bias
        w2=0.1 * jax.random.normal(ks[5], (C, C, K), jnp.float32),   # conv2.weight
        b2=0.1 * jax.random.normal(ks[6], (C,), jnp.float32),        # conv2.bias
        g3=1.0 + 0.1 * jax.random.normal(ks[7], (C,), jnp.float32),  # bn3.weight
        be3=0.1 * jax.random.normal(ks[8], (C,), jnp.float32),       # bn3.bias
    )

    # reference first: the kernel output aliases / may donate x's buffer
    ref = np.asarray(_reference_nlc(x, params, K))

    run = jax.jit(functools.partial(res_block_up_nlc, kernel_size=K),
                  donate_argnums=(0,))
    out = jax.block_until_ready(run(x, params))

    np.testing.assert_allclose(np.asarray(out), ref, rtol=2e-3, atol=2e-3)
    print("KERNEL_OK")
</pallas_src>

<mosaic_0001>
module attributes {stable_mosaic.version = 11 : i64} {
  func.func @kernel(%arg0: memref<2x16x128xf32, #tpu.memory_space<vmem>>, %arg1: memref<48x1xf32, #tpu.memory_space<vmem>>, %arg2: memref<3x128x128xbf16, #tpu.memory_space<vmem>>, %arg3: memref<1x128xf32, #tpu.memory_space<vmem>>, %arg4: memref<1x128xf32, #tpu.memory_space<vmem>>, %arg5: memref<3x128x128xbf16, #tpu.memory_space<vmem>>, %arg6: memref<1x128xf32, #tpu.memory_space<vmem>>, %arg7: memref<1x128xf32, #tpu.memory_space<vmem>>, %arg8: memref<2x16x128xf32, #tpu.memory_space<vmem>>, %arg9: memref<64x128xf32, #tpu.memory_space<vmem>>) attributes {dimension_semantics = [], scalar_prefetch = 0 : i64, scratch_operands = 1 : i64, tpu.core_type = #tpu.core_type<tc>} {
    %cst = arith.constant 0.000000e+00 : f32
    %0 = vector.broadcast %cst : f32 to vector<8x128xf32>
    %c0 = arith.constant 0 : index
    %c0_0 = arith.constant 0 : index
    %1 = vector.load %arg9[%c0, %c0_0] : memref<64x128xf32, #tpu.memory_space<vmem>>, vector<8x128xf32>
    tpu.vector_store %arg9[%c0, %c0_0], %0 {strides = array<i32>} : memref<64x128xf32, #tpu.memory_space<vmem>>, vector<8x128xf32>,
    %cst_1 = arith.constant 0.000000e+00 : f32
    %2 = vector.broadcast %cst_1 : f32 to vector<16x128xf32>
    %c24 = arith.constant 24 : index
    %c0_2 = arith.constant 0 : index
    %3 = vector.load %arg9[%c24, %c0_2] : memref<64x128xf32, #tpu.memory_space<vmem>>, vector<16x128xf32>
    tpu.vector_store %arg9[%c24, %c0_2], %2 {strides = array<i32>} : memref<64x128xf32, #tpu.memory_space<vmem>>, vector<16x128xf32>,
    %cst_3 = arith.constant 0.000000e+00 : f32
    %4 = vector.broadcast %cst_3 : f32 to vector<8x128xf32>
    %c56 = arith.constant 56 : index
    %c0_4 = arith.constant 0 : index
    %5 = vector.load %arg9[%c56, %c0_4] : memref<64x128xf32, #tpu.memory_space<vmem>>, vector<8x128xf32>
    tpu.vector_store %arg9[%c56, %c0_4], %4 {strides = array<i32>} : memref<64x128xf32, #tpu.memory_space<vmem>>, vector<8x128xf32>,
    %c0_5 = arith.constant 0 : index
    %c0_6 = arith.constant 0 : index
    %c0_7 = arith.constant 0 : index
    %6 = vector.load %arg0[%c0_5, %c0_6, %c0_7] : memref<2x16x128xf32, #tpu.memory_space<vmem>>, vector<1x16x128xf32>
    %7 = vector.shape_cast %6 : vector<1x16x128xf32> to vector<16x128xf32>
    %c8 = arith.constant 8 : index
    %c0_8 = arith.constant 0 : index
    %8 = vector.load %arg9[%c8, %c0_8] : memref<64x128xf32, #tpu.memory_space<vmem>>, vector<16x128xf32>
    tpu.vector_store %arg9[%c8, %c0_8], %7 {strides = array<i32>} : memref<64x128xf32, #tpu.memory_space<vmem>>, vector<16x128xf32>,
    %c1 = arith.constant 1 : index
    %c0_9 = arith.constant 0 : index
    %c0_10 = arith.constant 0 : index
    %9 = vector.load %arg0[%c1, %c0_9, %c0_10] : memref<2x16x128xf32, #tpu.memory_space<vmem>>, vector<1x16x128xf32>
    %10 = vector.shape_cast %9 : vector<1x16x128xf32> to vector<16x128xf32>
    %c40 = arith.constant 40 : index
    %c0_11 = arith.constant 0 : index
    %11 = vector.load %arg9[%c40, %c0_11] : memref<64x128xf32, #tpu.memory_space<vmem>>, vector<16x128xf32>
    tpu.vector_store %arg9[%c40, %c0_11], %10 {strides = array<i32>} : memref<64x128xf32, #tpu.memory_space<vmem>>, vector<16x128xf32>,
    %c0_12 = arith.constant 0 : index
    %c0_13 = arith.constant 0 : index
    %12 = vector.load %arg1[%c0_12, %c0_13] : memref<48x1xf32, #tpu.memory_space<vmem>>, vector<48x1xf32>
    %c7 = arith.constant 7 : index
    %c0_14 = arith.constant 0 : index
    %13 = vector.load %arg9[%c7, %c0_14] : memref<64x128xf32, #tpu.memory_space<vmem>>, vector<48x128xf32>
    %14 = arith.truncf %13 : vector<48x128xf32> to vector<48x128xbf16>
    %c0_15 = arith.constant 0 : index
    %c0_16 = arith.constant 0 : index
    %c0_17 = arith.constant 0 : index
    %15 = vector.load %arg2[%c0_15, %c0_16, %c0_17] : memref<3x128x128xbf16, #tpu.memory_space<vmem>>, vector<1x128x128xbf16>
    %16 = vector.shape_cast %15 : vector<1x128x128xbf16> to vector<128x128xbf16>
    %cst_18 = arith.constant dense<0.000000e+00> : vector<48x128xf32>
    %17 = tpu.matmul %14, %16, %cst_18 {dimension_numbers = #tpu.dot_dimension_numbers<[1], [0], [0], [1], [0, 0, 1, 1], [], []>} : vector<48x128xbf16>, vector<128x128xbf16>, vector<48x128xf32> -> vector<48x128xf32>
    %c8_19 = arith.constant 8 : index
    %c0_20 = arith.constant 0 : index
    %18 = vector.load %arg9[%c8_19, %c0_20] : memref<64x128xf32, #tpu.memory_space<vmem>>, vector<48x128xf32>
    %19 = arith.truncf %18 : vector<48x128xf32> to vector<48x128xbf16>
    %c1_21 = arith.constant 1 : index
    %c0_22 = arith.constant 0 : index
    %c0_23 = arith.constant 0 : index
    %20 = vector.load %arg2[%c1_21, %c0_22, %c0_23] : memref<3x128x128xbf16, #tpu.memory_space<vmem>>, vector<1x128x128xbf16>
    %21 = vector.shape_cast %20 : vector<1x128x128xbf16> to vector<128x128xbf16>
    %cst_24 = arith.constant dense<0.000000e+00> : vector<48x128xf32>
    %22 = tpu.matmul %19, %21, %cst_24 {dimension_numbers = #tpu.dot_dimension_numbers<[1], [0], [0], [1], [0, 0, 1, 1], [], []>} : vector<48x128xbf16>, vector<128x128xbf16>, vector<48x128xf32> -> vector<48x128xf32>
    %23 = arith.addf %17, %22 : vector<48x128xf32>
    %c9 = arith.constant 9 : index
    %c0_25 = arith.constant 0 : index
    %24 = vector.load %arg9[%c9, %c0_25] : memref<64x128xf32, #tpu.memory_space<vmem>>, vector<48x128xf32>
    %25 = arith.truncf %24 : vector<48x128xf32> to vector<48x128xbf16>
    %c2 = arith.constant 2 : index
    %c0_26 = arith.constant 0 : index
    %c0_27 = arith.constant 0 : index
    %26 = vector.load %arg2[%c2, %c0_26, %c0_27] : memref<3x128x128xbf16, #tpu.memory_space<vmem>>, vector<1x128x128xbf16>
    %27 = vector.shape_cast %26 : vector<1x128x128xbf16> to vector<128x128xbf16>
    %cst_28 = arith.constant dense<0.000000e+00> : vector<48x128xf32>
    %28 = tpu.matmul %25, %27, %cst_28 {dimension_numbers = #tpu.dot_dimension_numbers<[1], [0], [0], [1], [0, 0, 1, 1], [], []>} : vector<48x128xbf16>, vector<128x128xbf16>, vector<48x128xf32> -> vector<48x128xf32>
    %29 = arith.addf %23, %28 : vector<48x128xf32>
    %30 = vector.broadcast %12 : vector<48x1xf32> to vector<48x128xf32>
    %31 = arith.mulf %29, %30 : vector<48x128xf32>
    %cst_29 = arith.constant dense<0.000000e+00> : vector<128xf32>
    %32 = vector.multi_reduction <add>, %31, %cst_29 [0] : vector<48x128xf32> to vector<128xf32>
    %33 = vector.shape_cast %32 : vector<128xf32> to vector<1x128xf32>
    %cst_30 = arith.constant 3.125000e-02 : f32
    %34 = vector.broadcast %cst_30 : f32 to vector<1x128xf32>
    %35 = arith.mulf %33, %34 : vector<1x128xf32>
    %36 = vector.broadcast %35 : vector<1x128xf32> to vector<48x128xf32>
    %37 = arith.subf %31, %36 : vector<48x128xf32>
    %38 = vector.broadcast %12 : vector<48x1xf32> to vector<48x128xf32>
    %39 = arith.mulf %37, %38 : vector<48x128xf32>
    %40 = arith.mulf %39, %39 : vector<48x128xf32>
    %cst_31 = arith.constant dense<0.000000e+00> : vector<128xf32>
    %41 = vector.multi_reduction <add>, %40, %cst_31 [0] : vector<48x128xf32> to vector<128xf32>
    %42 = vector.shape_cast %41 : vector<128xf32> to vector<1x128xf32>
    %cst_32 = arith.constant 3.125000e-02 : f32
    %43 = vector.broadcast %cst_32 : f32 to vector<1x128xf32>
    %44 = arith.mulf %42, %43 : vector<1x128xf32>
    %cst_33 = arith.constant 9.99999974E-6 : f32
    %45 = vector.broadcast %cst_33 : f32 to vector<1x128xf32>
    %46 = arith.addf %44, %45 : vector<1x128xf32>
    %47 = math.rsqrt %46 : vector<1x128xf32>
    %c0_34 = arith.constant 0 : index
    %c0_35 = arith.constant 0 : index
    %48 = vector.load %arg3[%c0_34, %c0_35] : memref<1x128xf32, #tpu.memory_space<vmem>>, vector<1x128xf32>
    %49 = arith.mulf %47, %48 : vector<1x128xf32>
    %50 = vector.broadcast %49 : vector<1x128xf32> to vector<48x128xf32>
    %51 = arith.mulf %39, %50 : vector<48x128xf32>
    %c0_36 = arith.constant 0 : index
    %c0_37 = arith.constant 0 : index
    %52 = vector.load %arg4[%c0_36, %c0_37] : memref<1x128xf32, #tpu.memory_space<vmem>>, vector<1x128xf32>
    %53 = vector.broadcast %52 : vector<1x128xf32> to vector<48x128xf32>
    %54 = arith.addf %51, %53 : vector<48x128xf32>
    %cst_38 = arith.constant 0.000000e+00 : f32
    %55 = vector.broadcast %cst_38 : f32 to vector<48x128xf32>
    %56 = arith.maximumf %54, %55 : vector<48x128xf32>
    %57 = vector.broadcast %12 : vector<48x1xf32> to vector<48x128xf32>
    %58 = arith.mulf %56, %57 : vector<48x128xf32>
    %c8_39 = arith.constant 8 : index
    %c0_40 = arith.constant 0 : index
    %59 = vector.load %arg9[%c8_39, %c0_40] : memref<64x128xf32, #tpu.memory_space<vmem>>, vector<48x128xf32>
    tpu.vector_store %arg9[%c8_39, %c0_40], %58 {strides = array<i32>} : memref<64x128xf32, #tpu.memory_space<vmem>>, vector<48x128xf32>,
    %c7_41 = arith.constant 7 : index
    %c0_42 = arith.constant 0 : index
    %60 = vector.load %arg9[%c7_41, %c0_42] : memref<64x128xf32, #tpu.memory_space<vmem>>, vector<48x128xf32>
    %61 = arith.truncf %60 : vector<48x128xf32> to vector<48x128xbf16>
    %c0_43 = arith.constant 0 : index
    %c0_44 = arith.constant 0 : index
    %c0_45 = arith.constant 0 : index
    %62 = vector.load %arg5[%c0_43, %c0_44, %c0_45] : memref<3x128x128xbf16, #tpu.memory_space<vmem>>, vector<1x128x128xbf16>
    %63 = vector.shape_cast %62 : vector<1x128x128xbf16> to vector<128x128xbf16>
    %cst_46 = arith.constant dense<0.000000e+00> : vector<48x128xf32>
    %64 = tpu.matmul %61, %63, %cst_46 {dimension_numbers = #tpu.dot_dimension_numbers<[1], [0], [0], [1], [0, 0, 1, 1], [], []>} : vector<48x128xbf16>, vector<128x128xbf16>, vector<48x128xf32> -> vector<48x128xf32>
    %c8_47 = arith.constant 8 : index
    %c0_48 = arith.constant 0 : index
    %65 = vector.load %arg9[%c8_47, %c0_48] : memref<64x128xf32, #tpu.memory_space<vmem>>, vector<48x128xf32>
    %66 = arith.truncf %65 : vector<48x128xf32> to vector<48x128xbf16>
    %c1_49 = arith.constant 1 : index
    %c0_50 = arith.constant 0 : index
    %c0_51 = arith.constant 0 : index
    %67 = vector.load %arg5[%c1_49, %c0_50, %c0_51] : memref<3x128x128xbf16, #tpu.memory_space<vmem>>, vector<1x128x128xbf16>
    %68 = vector.shape_cast %67 : vector<1x128x128xbf16> to vector<128x128xbf16>
    %cst_52 = arith.constant dense<0.000000e+00> : vector<48x128xf32>
    %69 = tpu.matmul %66, %68, %cst_52 {dimension_numbers = #tpu.dot_dimension_numbers<[1], [0], [0], [1], [0, 0, 1, 1], [], []>} : vector<48x128xbf16>, vector<128x128xbf16>, vector<48x128xf32> -> vector<48x128xf32>
    %70 = arith.addf %64, %69 : vector<48x128xf32>
    %c9_53 = arith.constant 9 : index
    %c0_54 = arith.constant 0 : index
    %71 = vector.load %arg9[%c9_53, %c0_54] : memref<64x128xf32, #tpu.memory_space<vmem>>, vector<48x128xf32>
    %72 = arith.truncf %71 : vector<48x128xf32> to vector<48x128xbf16>
    %c2_55 = arith.constant 2 : index
    %c0_56 = arith.constant 0 : index
    %c0_57 = arith.constant 0 : index
    %73 = vector.load %arg5[%c2_55, %c0_56, %c0_57] : memref<3x128x128xbf16, #tpu.memory_space<vmem>>, vector<1x128x128xbf16>
    %74 = vector.shape_cast %73 : vector<1x128x128xbf16> to vector<128x128xbf16>
    %cst_58 = arith.constant dense<0.000000e+00> : vector<48x128xf32>
    %75 = tpu.matmul %72, %74, %cst_58 {dimension_numbers = #tpu.dot_dimension_numbers<[1], [0], [0], [1], [0, 0, 1, 1], [], []>} : vector<48x128xbf16>, vector<128x128xbf16>, vector<48x128xf32> -> vector<48x128xf32>
    %76 = arith.addf %70, %75 : vector<48x128xf32>
    %77 = vector.broadcast %12 : vector<48x1xf32> to vector<48x128xf32>
    %78 = arith.mulf %76, %77 : vector<48x128xf32>
    %cst_59 = arith.constant dense<0.000000e+00> : vector<128xf32>
    %79 = vector.multi_reduction <add>, %78, %cst_59 [0] : vector<48x128xf32> to vector<128xf32>
    %80 = vector.shape_cast %79 : vector<128xf32> to vector<1x128xf32>
    %cst_60 = arith.constant 3.125000e-02 : f32
    %81 = vector.broadcast %cst_60 : f32 to vector<1x128xf32>
    %82 = arith.mulf %80, %81 : vector<1x128xf32>
    %83 = vector.broadcast %82 : vector<1x128xf32> to vector<48x128xf32>
    %84 = arith.subf %78, %83 : vector<48x128xf32>
    %85 = vector.broadcast %12 : vector<48x1xf32> to vector<48x128xf32>
    %86 = arith.mulf %84, %85 : vector<48x128xf32>
    %87 = arith.mulf %86, %86 : vector<48x128xf32>
    %cst_61 = arith.constant dense<0.000000e+00> : vector<128xf32>
    %88 = vector.multi_reduction <add>, %87, %cst_61 [0] : vector<48x128xf32> to vector<128xf32>
    %89 = vector.shape_cast %88 : vector<128xf32> to vector<1x128xf32>
    %cst_62 = arith.constant 3.125000e-02 : f32
    %90 = vector.broadcast %cst_62 : f32 to vector<1x128xf32>
    %91 = arith.mulf %89, %90 : vector<1x128xf32>
    %cst_63 = arith.constant 9.99999974E-6 : f32
    %92 = vector.broadcast %cst_63 : f32 to vector<1x128xf32>
    %93 = arith.addf %91, %92 : vector<1x128xf32>
    %94 = math.rsqrt %93 : vector<1x128xf32>
    %c0_64 = arith.constant 0 : index
    %c0_65 = arith.constant 0 : index
    %95 = vector.load %arg6[%c0_64, %c0_65] : memref<1x128xf32, #tpu.memory_space<vmem>>, vector<1x128xf32>
    %96 = arith.mulf %94, %95 : vector<1x128xf32>
    %97 = vector.broadcast %96 : vector<1x128xf32> to vector<48x128xf32>
    %98 = arith.mulf %86, %97 : vector<48x128xf32>
    %c0_66 = arith.constant 0 : index
    %c0_67 = arith.constant 0 : index
    %99 = vector.load %arg7[%c0_66, %c0_67] : memref<1x128xf32, #tpu.memory_space<vmem>>, vector<1x128xf32>
    %100 = vector.broadcast %99 : vector<1x128xf32> to vector<48x128xf32>
    %101 = arith.addf %98, %100 : vector<48x128xf32>
    %cst_68 = arith.constant 0.000000e+00 : f32
    %102 = vector.broadcast %cst_68 : f32 to vector<48x128xf32>
    %103 = arith.maximumf %101, %102 : vector<48x128xf32>
    %104 = vector.extract_strided_slice %103 {offsets = [0, 0], sizes = [16, 128], strides = [1, 1]} : vector<48x128xf32> to vector<16x128xf32>
    %c0_69 = arith.constant 0 : index
    %c0_70 = arith.constant 0 : index
    %c0_71 = arith.constant 0 : index
    %105 = vector.load %arg0[%c0_69, %c0_70, %c0_71] : memref<2x16x128xf32, #tpu.memory_space<vmem>>, vector<1x16x128xf32>
    %106 = vector.shape_cast %105 : vector<1x16x128xf32> to vector<16x128xf32>
    %107 = arith.addf %104, %106 : vector<16x128xf32>
    %c0_72 = arith.constant 0 : index
    %c0_73 = arith.constant 0 : index
    %c0_74 = arith.constant 0 : index
    %108 = vector.load %arg8[%c0_72, %c0_73, %c0_74] : memref<2x16x128xf32, #tpu.memory_space<vmem>>, vector<1x16x128xf32>
    %109 = vector.shape_cast %108 : vector<1x16x128xf32> to vector<16x128xf32>
    %110 = vector.shape_cast %107 : vector<16x128xf32> to vector<1x16x128xf32>
    tpu.vector_store %arg8[%c0_72, %c0_73, %c0_74], %110 {strides = array<i32>} : memref<2x16x128xf32, #tpu.memory_space<vmem>>, vector<1x16x128xf32>,
    %111 = vector.extract_strided_slice %103 {offsets = [32, 0], sizes = [16, 128], strides = [1, 1]} : vector<48x128xf32> to vector<16x128xf32>
    %c1_75 = arith.constant 1 : index
    %c0_76 = arith.constant 0 : index
    %c0_77 = arith.constant 0 : index
    %112 = vector.load %arg0[%c1_75, %c0_76, %c0_77] : memref<2x16x128xf32, #tpu.memory_space<vmem>>, vector<1x16x128xf32>
    %113 = vector.shape_cast %112 : vector<1x16x128xf32> to vector<16x128xf32>
    %114 = arith.addf %111, %113 : vector<16x128xf32>
    %c1_78 = arith.constant 1 : index
    %c0_79 = arith.constant 0 : index
    %c0_80 = arith.constant 0 : index
    %115 = vector.load %arg8[%c1_78, %c0_79, %c0_80] : memref<2x16x128xf32, #tpu.memory_space<vmem>>, vector<1x16x128xf32>
    %116 = vector.shape_cast %115 : vector<1x16x128xf32> to vector<16x128xf32>
    %117 = vector.shape_cast %114 : vector<16x128xf32> to vector<1x16x128xf32>
    tpu.vector_store %arg8[%c1_78, %c0_79, %c0_80], %117 {strides = array<i32>} : memref<2x16x128xf32, #tpu.memory_space<vmem>>, vector<1x16x128xf32>,
    return
  }
}

</mosaic_0001>

<bundles_post_ra>
// kernel: res_block_up_nlc.1
= control target key start
LH: loop header
LB: loop body
LE: loop exit
PB: predicated region body
PF: predicated region fallthrough
CT: control target
= control target key end

     0   :  { %13 = vsyncpa [#allocation4], 0  ;;  %s2007_s0 = inlined_call_operand.hbm [shape: f32[2,16,128], index: 0, kind: input, shape index: {}, may-alias: {0,8}]   ;;  %s2008_s1 = inlined_call_operand.vmem [shape: f32[48,1], index: 1, kind: input, shape index: {}]   ;;  %s2009_s2 = inlined_call_operand.vmem [shape: bf16[3,128,128], index: 2, kind: input, shape index: {}]   ;;  %s2010_s3 = inlined_call_operand.vmem [shape: f32[1,128], index: 3, kind: input, shape index: {}]   ;;  %s2011_s4 = inlined_call_operand.vmem [shape: f32[1,128], index: 4, kind: input, shape index: {}]   ;;  %s2012_s5 = inlined_call_operand.vmem [shape: bf16[3,128,128], index: 5, kind: input, shape index: {}]   ;;  %s2013_s6 = inlined_call_operand.vmem [shape: f32[1,128], index: 6, kind: input, shape index: {}]   ;;  %s2014_s7 = inlined_call_operand.vmem [shape: f32[1,128], index: 7, kind: input, shape index: {}]   ;;  %s2015_s8 = inlined_call_operand.hbm [shape: f32[2,16,128], index: 8, kind: output, shape index: {}, may-alias: {0,8}]  }
   0x1   :  { %14 = vsyncpa [#allocation5], 0  ;;  %s1593_s27 = smov [#allocation3]   ;;  %s1545_s9 = scalar_lea.hbm %s2007_s0, 512 }
   0x2   :  { %s20_s28 = sshll.u32 %s1593_s27, 4  ;;  %p1546_p0 = scmp.ne.s32.totalorder %s2007_s0, %s1545_s9  ;;  %s21_s28 = int_to_ptr.vmem [resolvable:$true] %s20_s28 }
   0x3   :  { %p1549_p1 = scmp.lt.u32.totalorder %s1545_s9, %s2007_s0 }
   0x5   :  { %p1551_p2 = pnand %p1549_p1, %p1546_p0 }
   0x7   :  { %1554 = shalt.err (!%p1551_p2)
}
   0x8   :  { %s1555_s14 = scalar_lea.vmem %s21_s28, 512  ;;  %p1560_p4 = scmp.lt.s32.totalorder %s21_s28, %s21_s28 }
   0x9   :  { %p1556_p3 = scmp.ne.s32.totalorder %s21_s28, %s1555_s14  ;;  %p1561_p5 = scmp.lt.s32.totalorder %s1555_s14, %s1555_s14 }
   0xb   :  { %p1562_p6 = por %p1561_p5, %p1560_p4 }
   0xd   :  { %p1563_p7 = pnand %p1562_p6, %p1556_p3 }
   0xf   :  { %1566 = shalt.err (!%p1563_p7)
}
  0x10   :  { %s1594_s15 = smov 128   ;;  %s1595_s16 = smov 8  }
  0x11   :  { %26 = dma.hbm_to_vmem [thread:$0]  %s2007_s0, 512, %s21_s28, [#allocation4], %s1594_s15, %s1594_s15, %s1595_s16  }
  0x12   :  { %1589 = dma.done.wait [#allocation4], 512  }
  0x13   :  { %1590 = vsyncadd [#allocation4], 4294966784  ;;  %v1596_v0 = vmov 0.0   ;;  %vm1597_vm0 = vmmov 0   ;;  %v1598_v1 = vmov 0   ;;  %v1493_v2 = vld [vmem:[%s2009_s2 + $0x40] sm:$0xff]  }
  0x14   :  { %1268 = vmatprep.subr.bf16.mxu0 %v1596_v0  ;;  %45 = vst [vmem:[#allocation2] sm:$0xff] %v1596_v0  ;;  %46 = vst [vmem:[#allocation2 + $0x18] sm:$0xff] %v1596_v0  ;;  %1284 = vmatprep.mubr.msk.bf16.mxu0 %vm1597_vm0, %v1596_v0  ;;  %v1494_v3 = vld [vmem:[%s2009_s2 + $0x48] sm:$0xff]   ;;  %v1495_v4 = vld [vmem:[%s2009_s2 + $0x50] sm:$0xff]   ;;  %v1599_v25 = vmov 0.0|0.0   ;;  %s1600_s18 = smov [#allocation6]  }
  0x15   :  { %47 = vst [vmem:[#allocation2 + $0x20] sm:$0xff] %v1596_v0  ;;  %48 = vst [vmem:[#allocation2 + $0x38] sm:$0xff] %v1596_v0  ;;  %1491 = vset.pattern.permute.xlu0 %v1598_v1  ;;  %1492 = vset.pattern.permute.xlu1 %v1598_v1  ;;  %v1682_v5 = vld [vmem:[#allocation3] sm:$0xff]  ;;  %v1684_v6 = vld [vmem:[#allocation3 + $0x8] sm:$0xff]  ;;  %s1076_s0 = sshll.u32 %s1600_s18, 4  ;;  %s1077_s0 = int_to_ptr.vmem [resolvable:$true] %s1076_s0 }
  0x16   :  { %1352 = vmatprep.subr.bf16.mxu1 %v1596_v0  ;;  %1368 = vmatprep.mubr.msk.bf16.mxu1 %vm1597_vm0, %v1596_v0  ;;  %51 = vst [vmem:[#allocation2 + $0x8] sm:$0xff] %v1682_v5  ;;  %52 = vst [vmem:[#allocation2 + $0x10] sm:$0xff] %v1684_v6  ;;  %v1496_v7 = vld [vmem:[%s2009_s2 + $0x58] sm:$0xff]   ;;  %v1497_v8 = vld [vmem:[%s2009_s2 + $0x60] sm:$0xff]   ;;  %v95_v14 = vpack.c.bf16 %v1684_v6, %v1682_v5  ;;  %p1572_p9 = scmp.lt.s32.totalorder %s1077_s0, %s1077_s0 }
  0x17   :  { %1269 = vmatpush3.bf16.msra.mxu0 %v1493_v2  ;;  %v1695_v9 = vld [vmem:[#allocation3 + $0x10] sm:$0xff]  ;;  %v1698_v10 = vld [vmem:[#allocation3 + $0x18] sm:$0xff]  ;;  %v1498_v11 = vld [vmem:[%s2009_s2 + $0x68] sm:$0xff]  }
  0x18   :  { %1270 = vmatprep.subr.bf16.mxu0 %v1596_v0  ;;  %56 = vst [vmem:[#allocation2 + $0x28] sm:$0xff] %v1695_v9  ;;  %57 = vst [vmem:[#allocation2 + $0x30] sm:$0xff] %v1698_v10  ;;  %v1499_v12 = vld [vmem:[%s2009_s2 + $0x70] sm:$0xff]   ;;  %v1500_v13 = vld [vmem:[%s2009_s2 + $0x78] sm:$0xff]   ;;  %v97_v27 = vpack.c.bf16 %v1698_v10, %v1695_v9 }
  0x19   :  { %v58_v15 = vld [vmem:[%s2008_s1] sm:$0xff]  ;;  %v60_v16 = vld [vmem:[%s2008_s1 + $0x10] sm:$0xff]  ;;  %v59_v18 = vld [vmem:[%s2008_s1 + $0x8] sm:$0xff] }
  0x1a   :  { %v1501_v17 = vld [vmem:[%s2009_s2] sm:$0xff]   ;;  %464 = vperm.xlu0 %1491, %v58_v15   ;;  %474 = vperm.xlu1 %1492, %v60_v16   ;;  %v61_v19 = vld [vmem:[%s2008_s1 + $0x18] sm:$0xff]  ;;  %v1502_v20 = vld [vmem:[%s2009_s2 + $0x8] sm:$0xff]  }
  0x1b   :  { %1271 = vmatpush3.bf16.msra.mxu0 %v1494_v3  ;;  %v62_v21 = vld [vmem:[%s2008_s1 + $0x20] sm:$0xff]  ;;  %v63_v22 = vld [vmem:[%s2008_s1 + $0x28] sm:$0xff]  ;;  %v1503_v23 = vld [vmem:[%s2009_s2 + $0x10] sm:$0xff]  }
  0x1c   :  { %1272 = vmatprep.subr.bf16.mxu0 %v1596_v0  ;;  %v1504_v24 = vld [vmem:[%s2009_s2 + $0x18] sm:$0xff]   ;;  %v1505_v26 = vld [vmem:[%s2009_s2 + $0x20] sm:$0xff]   ;;  %v1506_v28 = vld [vmem:[%s2009_s2 + $0x28] sm:$0xff]  }
  0x1d   :  { %v1507_v29 = vld [vmem:[%s2009_s2 + $0x30] sm:$0xff]   ;;  %v1508_v30 = vld [vmem:[%s2009_s2 + $0x38] sm:$0xff]   ;;  %v64_v31 = vld [vmem:[#allocation2 + $0x7] sm:$0xff] }
  0x1e   :  { %469 = vperm.xlu0 %1491, %v59_v18   ;;  %479 = vperm.xlu1 %1492, %v61_v19   ;;  %v65_v32 = vld [vmem:[#allocation2 + $0xf] sm:$0xff]  ;;  %v1509_v34 = vld [vmem:[%s2009_s2 + $0x80] sm:$0xff]   ;;  %v66_v36 = vld [vmem:[#allocation2 + $0x17] sm:$0xff] }
  0x1f   :  { %1273 = vmatpush3.bf16.msra.mxu0 %v1495_v4  ;;  %v70_v33 = vpack.c.bf16 %v65_v32, %v64_v31  ;;  %v1510_v35 = vld [vmem:[%s2009_s2 + $0x88] sm:$0xff]   ;;  %v67_v37 = vld [vmem:[#allocation2 + $0x1f] sm:$0xff]  ;;  %v1511_v39 = vld [vmem:[%s2009_s2 + $0x90] sm:$0xff]  }
  0x20   :  { %1274 = vmatprep.subr.bf16.mxu0 %v1596_v0  ;;  %v71_v38 = vpack.c.bf16 %v67_v37, %v66_v36  ;;  %v1512_v40 = vld [vmem:[%s2009_s2 + $0x98] sm:$0xff]   ;;  %v68_v41 = vld [vmem:[#allocation2 + $0x27] sm:$0xff]  ;;  %v69_v42 = vld [vmem:[#allocation2 + $0x2f] sm:$0xff] }
  0x21   :  { %v72_v43 = vpack.c.bf16 %v69_v42, %v68_v41  ;;  %v1513_v44 = vld [vmem:[%s2009_s2 + $0xa0] sm:$0xff]   ;;  %v1514_v45 = vld [vmem:[%s2009_s2 + $0xa8] sm:$0xff]   ;;  %v1515_v46 = vld [vmem:[%s2009_s2 + $0xb0] sm:$0xff]  }
  0x22   :  { %484 = vperm.xlu0 %1491, %v62_v21   ;;  %489 = vperm.xlu1 %1492, %v63_v22   ;;  %v1516_v47 = vld [vmem:[%s2009_s2 + $0xb8] sm:$0xff]   ;;  %v325_v48 = vld [vmem:[#allocation2 + $0x9] sm:$0xff]  ;;  %v328_v52 = vld [vmem:[#allocation2 + $0x21] sm:$0xff] }
  0x23   :  { %1275 = vmatpush3.bf16.msra.mxu0 %v1496_v7  ;;  %v326_v49 = vld [vmem:[#allocation2 + $0x11] sm:$0xff]  ;;  %v327_v51 = vld [vmem:[#allocation2 + $0x19] sm:$0xff]  ;;  %v329_v54 = vld [vmem:[#allocation2 + $0x29] sm:$0xff] }
  0x24   :  { %1276 = vmatprep.subr.bf16.mxu0 %v1596_v0  ;;  %v331_v50 = vpack.c.bf16 %v326_v49, %v325_v48  ;;  %v332_v53 = vpack.c.bf16 %v328_v52, %v327_v51  ;;  %v330_v55 = vld [vmem:[#allocation2 + $0x31] sm:$0xff]  ;;  %v1517_v57 = vld [vmem:[%s2012_s5 + $0x40] sm:$0xff]   ;;  %v1518_v58 = vld [vmem:[%s2012_s5 + $0x48] sm:$0xff]  }
  0x25   :  { %v333_v56 = vpack.c.bf16 %v330_v55, %v329_v54  ;;  %1353 = vmatpush3.bf16.msra.mxu1 %v1517_v57  ;;  %v1519_v59 = vld [vmem:[%s2012_s5 + $0x50] sm:$0xff]   ;;  %v1520_v60 = vld [vmem:[%s2012_s5 + $0x58] sm:$0xff]   ;;  %v1521_v61 = vld [vmem:[%s2012_s5 + $0x60] sm:$0xff]  }
  0x26   :  { %1354 = vmatprep.subr.bf16.mxu1 %v1596_v0  ;;  %v1522_v62 = vld [vmem:[%s2012_s5 + $0x68] sm:$0xff]   ;;  %v1523_v63 = vld [vmem:[%s2012_s5 + $0x70] sm:$0xff]   ;;  %v1524_v1 = vld [vmem:[%s2012_s5 + $0x78] sm:$0xff]  }
  0x27   :  { %1277 = vmatpush3.bf16.msra.mxu0 %v1497_v8 }
  0x28   :  { %1278 = vmatprep.subr.bf16.mxu0 %v1596_v0 }
  0x29   :  { %1355 = vmatpush3.bf16.msra.mxu1 %v1518_v58 }
  0x2a   :  { %1356 = vmatprep.subr.bf16.mxu1 %v1596_v0 }
  0x2b   :  { %1279 = vmatpush3.bf16.msra.mxu0 %v1498_v11 }
  0x2c   :  { %1280 = vmatprep.subr.bf16.mxu0 %v1596_v0 }
  0x2d   :  { %1357 = vmatpush3.bf16.msra.mxu1 %v1519_v59 }
  0x2e   :  { %1358 = vmatprep.subr.bf16.mxu1 %v1596_v0 }
  0x2f   :  { %1281 = vmatpush3.bf16.msra.mxu0 %v1499_v12 }
  0x30   :  { %1282 = vmatprep.subr.bf16.mxu0 %v1596_v0 }
  0x31   :  { %1359 = vmatpush3.bf16.msra.mxu1 %v1520_v60 }
  0x32   :  { %1360 = vmatprep.subr.bf16.mxu1 %v1596_v0 }
  0x33   :  { %1283 = vmatpush3.bf16.msra.mxu0 %v1500_v13 }
  0x34   :  { %1296 = vmatprep.subr.bf16.mxu0 %v1596_v0 }
  0x35   :  { %1361 = vmatpush3.bf16.msra.mxu1 %v1521_v61 }
  0x36   :  { %1285 = vmatmul.mubr.bf16.vlgmr.msra.gmra.mrb[0].mxu0 %v95_v14  ;;  %1362 = vmatprep.subr.bf16.mxu1 %v1596_v0 }
  0x37   :  { %1297 = vmatpush3.bf16.msra.mxu0 %v1501_v17  ;;  %1288 = vmatprep.mubr.msk.bf16.mxu0 %vm1597_vm0, %v1596_v0 }
  0x38   :  { %1298 = vmatprep.subr.bf16.mxu0 %v1596_v0 }
  0x39   :  { %1363 = vmatpush3.bf16.msra.mxu1 %v1522_v62 }
  0x3a   :  { %1364 = vmatprep.subr.bf16.mxu1 %v1596_v0 }
  0x3b   :  { %1299 = vmatpush3.bf16.msra.mxu0 %v1502_v20 }
  0x3c   :  { %1300 = vmatprep.subr.bf16.mxu0 %v1596_v0 }
  0x3d   :  { %1365 = vmatpush3.bf16.msra.mxu1 %v1523_v63 }
  0x3e   :  { %1289 = vmatmul.mubr.bf16.gmra.mrb[4].mxu0 %v1599_v25  ;;  %1366 = vmatprep.subr.bf16.mxu1 %v1596_v0 }
  0x3f   :  { %1301 = vmatpush3.bf16.msra.mxu0 %v1503_v23  ;;  %1292 = vmatprep.mubr.msk.bf16.mxu0 %vm1597_vm0, %v1596_v0 }
  0x40   :  { %1302 = vmatprep.subr.bf16.mxu0 %v1596_v0 }
  0x41   :  { %1367 = vmatpush3.bf16.msra.mxu1 %v1524_v1 }
  0x42   :  { %1380 = vmatprep.subr.bf16.mxu1 %v1596_v0 }
  0x43   :  { %1303 = vmatpush3.bf16.msra.mxu0 %v1504_v24 }
  0x44   :  { %1304 = vmatprep.subr.bf16.mxu0 %v1596_v0 }
  0x46   :  { %1293 = vmatmul.mubr.bf16.gmra.mrb[8].mxu0 %v97_v27 }
  0x47   :  { %1305 = vmatpush3.bf16.msra.mxu0 %v1505_v26  ;;  %1312 = vmatprep.mubr.msk.bf16.mxu0 %vm1597_vm0, %v1596_v0 }
  0x48   :  { %1306 = vmatprep.subr.bf16.mxu0 %v1596_v0 }
  0x4b   :  { %1307 = vmatpush3.bf16.msra.mxu0 %v1506_v28 }
  0x4c   :  { %1308 = vmatprep.subr.bf16.mxu0 %v1596_v0 }
  0x4f   :  { %1309 = vmatpush3.bf16.msra.mxu0 %v1507_v29 }
  0x50   :  { %1310 = vmatprep.subr.bf16.mxu0 %v1596_v0 }
  0x53   :  { %1311 = vmatpush3.bf16.msra.mxu0 %v1508_v30 }
  0x54   :  { %1324 = vmatprep.subr.bf16.mxu0 %v1596_v0 }
  0x56   :  { %1313 = vmatmul.mubr.bf16.vlgmr.msra.gmra.mrb[0].mxu0 %v70_v33 }
  0x57   :  { %1325 = vmatpush3.bf16.msra.mxu0 %v1509_v34  ;;  %1316 = vmatprep.mubr.msk.bf16.mxu0 %vm1597_vm0, %v1596_v0 }
  0x58   :  { %1326 = vmatprep.subr.bf16.mxu0 %v1596_v0 }
  0x5b   :  { %1327 = vmatpush3.bf16.msra.mxu0 %v1510_v35 }
  0x5c   :  { %1328 = vmatprep.subr.bf16.mxu0 %v1596_v0 }
  0x5e   :  { %1317 = vmatmul.mubr.bf16.gmra.mrb[4].mxu0 %v71_v38 }
  0x5f   :  { %1329 = vmatpush3.bf16.msra.mxu0 %v1511_v39  ;;  %1320 = vmatprep.mubr.msk.bf16.mxu0 %vm1597_vm0, %v1596_v0 }
  0x60   :  { %1330 = vmatprep.subr.bf16.mxu0 %v1596_v0 }
  0x63   :  { %1331 = vmatpush3.bf16.msra.mxu0 %v1512_v40 }
  0x64   :  { %1332 = vmatprep.subr.bf16.mxu0 %v1596_v0 }
  0x66   :  { %1321 = vmatmul.mubr.bf16.gmra.mrb[8].mxu0 %v72_v43 }
  0x67   :  { %1333 = vmatpush3.bf16.msra.mxu0 %v1513_v44  ;;  %1340 = vmatprep.mubr.msk.bf16.mxu0 %vm1597_vm0, %v1596_v0 }
  0x68   :  { %1334 = vmatprep.subr.bf16.mxu0 %v1596_v0 }
  0x6b   :  { %1335 = vmatpush3.bf16.msra.mxu0 %v1514_v45 }
  0x6c   :  { %1336 = vmatprep.subr.bf16.mxu0 %v1596_v0 }
  0x6f   :  { %1337 = vmatpush3.bf16.msra.mxu0 %v1515_v46 }
  0x70   :  { %1338 = vmatprep.subr.bf16.mxu0 %v1596_v0 }
  0x73   :  { %1339 = vmatpush3.bf16.msra.mxu0 %v1516_v47 }
  0x76   :  { %1341 = vmatmul.mubr.bf16.vlgmr.msra.gmra.mrb[0].mxu0 %v331_v50 }
  0x77   :  { %1344 = vmatprep.mubr.msk.bf16.mxu0 %vm1597_vm0, %v1596_v0 }
  0x7e   :  { %1345 = vmatmul.mubr.bf16.gmra.mrb[4].mxu0 %v332_v53 }
  0x7f   :  { %1348 = vmatprep.mubr.msk.bf16.mxu0 %vm1597_vm0, %v1596_v0 }
  0x86   :  { %1349 = vmatmul.mubr.bf16.gmra.mrb[8].mxu0 %v333_v56 }
  0x99   :  { %v1848_v2 = vpop.permute.xlu0 %464  ;;  %v1854_v14 = vpop.permute.xlu1 %474 }
  0x9d   :  { %v1850_v4 = vpop.permute.xlu0 %469  ;;  %v1857_v19 = vpop.permute.xlu1 %479 }
  0xa1   :  { %v1860_v25 = vpop.permute.xlu0 %484  ;;  %v1863_v29 = vpop.permute.xlu1 %489 }
 0x149   :  { %v433_v3 = vpop.f32.mrb[0].mxu0 }
 0x14a   :  { %v1342_v7 = vpop.f32.mrb[1].mxu0  ;;  %v492_v11 = vmul.f32 %v1848_v2, %v433_v3 }
 0x14b   :  { %v436_v8 = vpop.f32.mrb[2].mxu0 }
 0x14c   :  { %v493_v12 = vmul.f32 %v1850_v4, %v436_v8  ;;  %v1343_v13 = vpop.f32.mrb[3].mxu0 }
 0x14e   :  { %v498_v15 = vadd.f32 %v493_v12, %v492_v11 }
 0x151   :  { %v441_v16 = vpop.f32.mrb[4].mxu0 }
 0x152   :  { %v494_v17 = vmul.f32 %v1854_v14, %v441_v16  ;;  %v1346_v18 = vpop.f32.mrb[5].mxu0 }
 0x153   :  { %v444_v20 = vpop.f32.mrb[6].mxu0 }
 0x154   :  { %v499_v21 = vadd.f32 %v498_v15, %v494_v17  ;;  %v495_v22 = vmul.f32 %v1857_v19, %v444_v20  ;;  %v1347_v23 = vpop.f32.mrb[7].mxu0  ;;  %v542_v20 = vld [vmem:[%s2010_s3] sm:$0x1] }
 0x156   :  { %v500_v24 = vadd.f32 %v499_v21, %v495_v22 }
 0x159   :  { %v449_v26 = vpop.f32.mrb[8].mxu0 }
 0x15a   :  { %v496_v27 = vmul.f32 %v1860_v25, %v449_v26  ;;  %v1350_v28 = vpop.f32.mrb[9].mxu0  ;;  %v1144_v26 = vld [vmem:[%s2011_s4] ss:$0 sm:$0xff] }
 0x15b   :  { %v452_v30 = vpop.f32.mrb[10].mxu0 }
 0x15c   :  { %v501_v31 = vadd.f32 %v500_v24, %v496_v27  ;;  %v497_v32 = vmul.f32 %v1863_v29, %v452_v30  ;;  %v1351_v33 = vpop.f32.mrb[11].mxu0 }
 0x15e   :  { %v502_v34 = vadd.f32 %v501_v31, %v497_v32 }
 0x160   :  { %v503_v35 = vrot.slane %v502_v34, 4 }
 0x162   :  { %v504_v36 = vadd.f32 %v503_v35, %v502_v34 }
 0x164   :  { %v505_v37 = vrot.slane %v504_v36, 2 }
 0x166   :  { %v506_v38 = vadd.f32 %v505_v37, %v504_v36 }
 0x168   :  { %v507_v39 = vrot.slane %v506_v38, 1 }
 0x16a   :  { %v508_v40 = vadd.f32 %v507_v39, %v506_v38 }
 0x16c   :  { %v509_v41 = vmul.f32 0.03125, %v508_v40 }
 0x16e   :  { %v510_v42 = vsub.f32 %v492_v11, %v509_v41  ;;  %v511_v43 = vsub.f32 %v493_v12, %v509_v41  ;;  %v512_v44 = vsub.f32 %v494_v17, %v509_v41  ;;  %v513_v45 = vsub.f32 %v495_v22, %v509_v41 }
 0x16f   :  { %v514_v46 = vsub.f32 %v496_v27, %v509_v41  ;;  %v515_v47 = vsub.f32 %v497_v32, %v509_v41  ;;  %v544_v17 = vlaneseq }
 0x170   :  { %v516_v48 = vmul.f32 %v510_v42, %v1848_v2  ;;  %v517_v49 = vmul.f32 %v511_v43, %v1850_v4  ;;  %v518_v50 = vmul.f32 %v512_v44, %v1854_v14  ;;  %v519_v51 = vmul.f32 %v513_v45, %v1857_v19 }
 0x171   :  { %v520_v54 = vmul.f32 %v514_v46, %v1860_v25  ;;  %v521_v57 = vmul.f32 %v515_v47, %v1863_v29  ;;  %v1872_v18 = vshrl.u32 %v544_v17, 7 }
 0x172   :  { %v522_v52 = vmul.f32 %v516_v48, %v516_v48  ;;  %v523_v53 = vmul.f32 %v517_v49, %v517_v49  ;;  %v524_v55 = vmul.f32 %v518_v50, %v518_v50  ;;  %v525_v58 = vmul.f32 %v519_v51, %v519_v51 }
 0x173   :  { %v526_v60 = vmul.f32 %v520_v54, %v520_v54  ;;  %v527_v62 = vmul.f32 %v521_v57, %v521_v57  ;;  %v546_v21 = vsub.s32 0, %v1872_v18 }
 0x174   :  { %v528_v56 = vadd.f32 %v523_v53, %v522_v52  ;;  %v1525_v52 = vld [vmem:[%s2012_s5] sm:$0xff]  }
 0x176   :  { %v529_v59 = vadd.f32 %v528_v56, %v524_v55  ;;  %v1526_v56 = vld [vmem:[%s2012_s5 + $0x8] sm:$0xff]  }
 0x178   :  { %v530_v61 = vadd.f32 %v529_v59, %v525_v58  ;;  %v1528_v58 = vld [vmem:[%s2012_s5 + $0x18] sm:$0xff]   ;;  %v1529_v59 = vld [vmem:[%s2012_s5 + $0x20] sm:$0xff]  }
 0x17a   :  { %v531_v63 = vadd.f32 %v530_v61, %v526_v60  ;;  %v1530_v60 = vld [vmem:[%s2012_s5 + $0x28] sm:$0xff]   ;;  %v1531_v61 = vld [vmem:[%s2012_s5 + $0x30] sm:$0xff]  }
 0x17c   :  { %v532_v1 = vadd.f32 %v531_v63, %v527_v62  ;;  %v1532_v62 = vld [vmem:[%s2012_s5 + $0x38] sm:$0xff]  }
 0x17e   :  { %v533_v3 = vrot.slane %v532_v1, 4 }
 0x180   :  { %v534_v7 = vadd.f32 %v533_v3, %v532_v1  ;;  %v1533_v3 = vld [vmem:[%s2012_s5 + $0x80] sm:$0xff]  }
 0x182   :  { %v535_v8 = vrot.slane %v534_v7, 2 }
 0x184   :  { %v536_v11 = vadd.f32 %v535_v8, %v534_v7  ;;  %v1534_v8 = vld [vmem:[%s2012_s5 + $0x88] sm:$0xff]  }
 0x186   :  { %v537_v12 = vrot.slane %v536_v11, 1 }
 0x188   :  { %v538_v13 = vadd.f32 %v537_v12, %v536_v11 }
 0x18a   :  { %v539_v15 = vmul.f32 0.03125, %v538_v13  ;;  %v1535_v13 = vld [vmem:[%s2012_s5 + $0x90] sm:$0xff]  }
 0x18c   :  { %v540_v16 = vadd.f32 1e-05, %v539_v15 }
 0x18e   :  { %1541 = vrsqrt.f32 %v540_v16  ;;  %v1536_v16 = vld [vmem:[%s2012_s5 + $0x98] sm:$0xff]  }
 0x198   :  { %v1542_v22 = vpop.eup %1541 }
 0x199   :  { %v543_v23 = vmul.f32 %v1542_v22, %v542_v20  ;;  %v1537_v22 = vld [vmem:[%s2012_s5 + $0xa0] sm:$0xff]  }
 0x19b   :  { %v547_v24 = vrot.slane %v543_v23, %v546_v21 }
 0x19d   :  { %v548_v27 = vmul.f32 %v547_v24, %v516_v48  ;;  %v549_v28 = vmul.f32 %v547_v24, %v517_v49  ;;  %v550_v30 = vmul.f32 %v547_v24, %v518_v50  ;;  %v551_v31 = vmul.f32 %v547_v24, %v519_v51 }
 0x19e   :  { %v552_v32 = vmul.f32 %v547_v24, %v520_v54  ;;  %v553_v33 = vmul.f32 %v547_v24, %v521_v57  ;;  %v1527_v57 = vld [vmem:[%s2012_s5 + $0x10] sm:$0xff]   ;;  %v1538_v24 = vld [vmem:[%s2012_s5 + $0xa8] sm:$0xff]  }
 0x19f   :  { %v561_v34 = vadd.f32 %v1144_v26, %v548_v27  ;;  %v562_v35 = vadd.f32 %v1144_v26, %v549_v28  ;;  %v563_v36 = vadd.f32 %v1144_v26, %v550_v30  ;;  %v564_v37 = vadd.f32 %v1144_v26, %v551_v31  ;;  %v1540_v27 = vld [vmem:[%s2012_s5 + $0xb8] sm:$0xff]  }
 0x1a0   :  { %v565_v38 = vadd.f32 %v1144_v26, %v552_v32  ;;  %v566_v39 = vadd.f32 %v1144_v26, %v553_v33  ;;  %v1539_v26 = vld [vmem:[%s2012_s5 + $0xb0] sm:$0xff]  }
 0x1a1   :  { %v567_v40 = vmax.f32 %v561_v34, 0.0  ;;  %v568_v41 = vmax.f32 %v562_v35, 0.0  ;;  %v569_v42 = vmax.f32 %v563_v36, 0.0  ;;  %v570_v43 = vmax.f32 %v564_v37, 0.0 }
 0x1a2   :  { %v571_v44 = vmax.f32 %v565_v38, 0.0  ;;  %v572_v45 = vmax.f32 %v566_v39, 0.0 }
 0x1a3   :  { %v573_v46 = vmul.f32 %v567_v40, %v1848_v2  ;;  %v574_v47 = vmul.f32 %v568_v41, %v1850_v4  ;;  %v575_v48 = vmul.f32 %v569_v42, %v1854_v14  ;;  %v576_v49 = vmul.f32 %v570_v43, %v1857_v19 }
 0x1a4   :  { %v577_v50 = vmul.f32 %v571_v44, %v1860_v25  ;;  %v578_v51 = vmul.f32 %v572_v45, %v1863_v29 }
 0x1a5   :  { %579 = vst [vmem:[#allocation2 + $0x8] sm:$0xff] %v573_v46  ;;  %580 = vst [vmem:[#allocation2 + $0x10] sm:$0xff] %v574_v47  ;;  %v616_v53 = vpack.c.bf16 %v574_v47, %v573_v46  ;;  %v617_v54 = vpack.c.bf16 %v576_v49, %v575_v48 }
 0x1a6   :  { %581 = vst [vmem:[#allocation2 + $0x18] sm:$0xff] %v575_v48  ;;  %582 = vst [vmem:[#allocation2 + $0x20] sm:$0xff] %v576_v49  ;;  %v618_v55 = vpack.c.bf16 %v578_v51, %v577_v50 }
 0x1a7   :  { %584 = vst [vmem:[#allocation2 + $0x30] sm:$0xff] %v578_v51  ;;  %583 = vst [vmem:[#allocation2 + $0x28] sm:$0xff] %v577_v50  ;;  %1369 = vmatmul.mubr.bf16.vlgmr.msra.gmra.mrb[0].mxu1 %v616_v53 }
 0x1a8   :  { %1381 = vmatpush3.bf16.msra.mxu1 %v1525_v52  ;;  %1372 = vmatprep.mubr.msk.bf16.mxu1 %vm1597_vm0, %v1596_v0 }
 0x1a9   :  { %1382 = vmatprep.subr.bf16.mxu1 %v1596_v0 }
 0x1ac   :  { %1383 = vmatpush3.bf16.msra.mxu1 %v1526_v56  ;;  %v585_v63 = vld [vmem:[#allocation2 + $0x7] sm:$0xff]  ;;  %v586_v1 = vld [vmem:[#allocation2 + $0xf] sm:$0xff] }
 0x1ad   :  { %1384 = vmatprep.subr.bf16.mxu1 %v1596_v0  ;;  %v591_v7 = vpack.c.bf16 %v586_v1, %v585_v63  ;;  %v587_v11 = vld [vmem:[#allocation2 + $0x17] sm:$0xff]  ;;  %v588_v12 = vld [vmem:[#allocation2 + $0x1f] sm:$0xff]  ;;  %v846_v28 = vld [vmem:[#allocation2 + $0x9] sm:$0xff] }
 0x1ae   :  { %v592_v15 = vpack.c.bf16 %v588_v12, %v587_v11  ;;  %v589_v17 = vld [vmem:[#allocation2 + $0x27] sm:$0xff]  ;;  %v590_v20 = vld [vmem:[#allocation2 + $0x2f] sm:$0xff]  ;;  %v848_v32 = vld [vmem:[#allocation2 + $0x19] sm:$0xff] }
 0x1af   :  { %1373 = vmatmul.mubr.bf16.gmra.mrb[4].mxu1 %v617_v54  ;;  %v593_v23 = vpack.c.bf16 %v590_v20, %v589_v17  ;;  %v847_v30 = vld [vmem:[#allocation2 + $0x11] sm:$0xff]  ;;  %v849_v33 = vld [vmem:[#allocation2 + $0x21] sm:$0xff]  ;;  %v850_v35 = vld [vmem:[#allocation2 + $0x29] sm:$0xff] }
 0x1b0   :  { %1385 = vmatpush3.bf16.msra.mxu1 %v1527_v57  ;;  %1376 = vmatprep.mubr.msk.bf16.mxu1 %vm1597_vm0, %v1596_v0  ;;  %v852_v31 = vpack.c.bf16 %v847_v30, %v846_v28  ;;  %v853_v34 = vpack.c.bf16 %v849_v33, %v848_v32  ;;  %v851_v36 = vld [vmem:[#allocation2 + $0x31] sm:$0xff] }
 0x1b1   :  { %1386 = vmatprep.subr.bf16.mxu1 %v1596_v0  ;;  %v854_v37 = vpack.c.bf16 %v851_v36, %v850_v35 }
 0x1b4   :  { %1387 = vmatpush3.bf16.msra.mxu1 %v1528_v58 }
 0x1b5   :  { %1388 = vmatprep.subr.bf16.mxu1 %v1596_v0 }
 0x1b7   :  { %1377 = vmatmul.mubr.bf16.gmra.mrb[8].mxu1 %v618_v55 }
 0x1b8   :  { %1389 = vmatpush3.bf16.msra.mxu1 %v1529_v59  ;;  %1396 = vmatprep.mubr.msk.bf16.mxu1 %vm1597_vm0, %v1596_v0 }
 0x1b9   :  { %1390 = vmatprep.subr.bf16.mxu1 %v1596_v0 }
 0x1bc   :  { %1391 = vmatpush3.bf16.msra.mxu1 %v1530_v60 }
 0x1bd   :  { %1392 = vmatprep.subr.bf16.mxu1 %v1596_v0 }
 0x1c0   :  { %1393 = vmatpush3.bf16.msra.mxu1 %v1531_v61 }
 0x1c1   :  { %1394 = vmatprep.subr.bf16.mxu1 %v1596_v0 }
 0x1c4   :  { %1395 = vmatpush3.bf16.msra.mxu1 %v1532_v62 }
 0x1c5   :  { %1408 = vmatprep.subr.bf16.mxu1 %v1596_v0 }
 0x1c7   :  { %1397 = vmatmul.mubr.bf16.vlgmr.msra.gmra.mrb[0].mxu1 %v591_v7 }
 0x1c8   :  { %1409 = vmatpush3.bf16.msra.mxu1 %v1533_v3  ;;  %1400 = vmatprep.mubr.msk.bf16.mxu1 %vm1597_vm0, %v1596_v0 }
 0x1c9   :  { %1410 = vmatprep.subr.bf16.mxu1 %v1596_v0 }
 0x1cc   :  { %1411 = vmatpush3.bf16.msra.mxu1 %v1534_v8 }
 0x1cd   :  { %1412 = vmatprep.subr.bf16.mxu1 %v1596_v0 }
 0x1cf   :  { %1401 = vmatmul.mubr.bf16.gmra.mrb[4].mxu1 %v592_v15 }
 0x1d0   :  { %1413 = vmatpush3.bf16.msra.mxu1 %v1535_v13  ;;  %1404 = vmatprep.mubr.msk.bf16.mxu1 %vm1597_vm0, %v1596_v0 }
 0x1d1   :  { %1414 = vmatprep.subr.bf16.mxu1 %v1596_v0 }
 0x1d4   :  { %1415 = vmatpush3.bf16.msra.mxu1 %v1536_v16 }
 0x1d5   :  { %1416 = vmatprep.subr.bf16.mxu1 %v1596_v0 }
 0x1d7   :  { %1405 = vmatmul.mubr.bf16.gmra.mrb[8].mxu1 %v593_v23 }
 0x1d8   :  { %1417 = vmatpush3.bf16.msra.mxu1 %v1537_v22  ;;  %1424 = vmatprep.mubr.msk.bf16.mxu1 %vm1597_vm0, %v1596_v0 }
 0x1d9   :  { %1418 = vmatprep.subr.bf16.mxu1 %v1596_v0 }
 0x1dc   :  { %1419 = vmatpush3.bf16.msra.mxu1 %v1538_v24 }
 0x1dd   :  { %1420 = vmatprep.subr.bf16.mxu1 %v1596_v0 }
 0x1e0   :  { %1421 = vmatpush3.bf16.msra.mxu1 %v1539_v26 }
 0x1e1   :  { %1422 = vmatprep.subr.bf16.mxu1 %v1596_v0 }
 0x1e4   :  { %1423 = vmatpush3.bf16.msra.mxu1 %v1540_v27 }
 0x1e7   :  { %1425 = vmatmul.mubr.bf16.vlgmr.msra.gmra.mrb[0].mxu1 %v852_v31 }
 0x1e8   :  { %1428 = vmatprep.mubr.msk.bf16.mxu1 %vm1597_vm0, %v1596_v0 }
 0x1ef   :  { %1429 = vmatmul.mubr.bf16.gmra.mrb[4].mxu1 %v853_v34 }
 0x1f0   :  { %1432 = vmatprep.mubr.msk.bf16.mxu1 %vm1597_vm0, %v1596_v0 }
 0x1f7   :  { %1433 = vmatmul.mubr.bf16.gmra.mrb[8].mxu1 %v854_v37 }
 0x2ba   :  { %v954_v38 = vpop.f32.mrb[0].mxu1 }
 0x2bb   :  { %v1426_v39 = vpop.f32.mrb[1].mxu1  ;;  %v983_v41 = vmul.f32 %v954_v38, %v1848_v2 }
 0x2bc   :  { %v957_v40 = vpop.f32.mrb[2].mxu1 }
 0x2bd   :  { %v984_v42 = vmul.f32 %v957_v40, %v1850_v4  ;;  %v1427_v43 = vpop.f32.mrb[3].mxu1 }
 0x2bf   :  { %v989_v44 = vadd.f32 %v984_v42, %v983_v41 }
 0x2c2   :  { %v962_v45 = vpop.f32.mrb[4].mxu1 }
 0x2c3   :  { %v985_v46 = vmul.f32 %v962_v45, %v1854_v14  ;;  %v1430_v47 = vpop.f32.mrb[5].mxu1  ;;  %v1201_v45 = vld [vmem:[%s2014_s7] ss:$0 sm:$0xff] }
 0x2c4   :  { %v965_v48 = vpop.f32.mrb[6].mxu1 }
 0x2c5   :  { %v990_v49 = vadd.f32 %v989_v44, %v985_v46  ;;  %v986_v0 = vmul.f32 %v965_v48, %v1857_v19  ;;  %v1431_v50 = vpop.f32.mrb[7].mxu1 }
 0x2c7   :  { %v991_v51 = vadd.f32 %v990_v49, %v986_v0 }
 0x2ca   :  { %v970_v52 = vpop.f32.mrb[8].mxu1 }
 0x2cb   :  { %v987_v53 = vmul.f32 %v970_v52, %v1860_v25  ;;  %v1434_v54 = vpop.f32.mrb[9].mxu1 }
 0x2cc   :  { %v973_v55 = vpop.f32.mrb[10].mxu1 }
 0x2cd   :  { %v992_v56 = vadd.f32 %v991_v51, %v987_v53  ;;  %v988_v57 = vmul.f32 %v973_v55, %v1863_v29  ;;  %v1435_v58 = vpop.f32.mrb[11].mxu1 }
 0x2cf   :  { %v993_v59 = vadd.f32 %v992_v56, %v988_v57 }
 0x2d1   :  { %v994_v60 = vrot.slane %v993_v59, 4 }
 0x2d3   :  { %v995_v61 = vadd.f32 %v994_v60, %v993_v59 }
 0x2d5   :  { %v996_v62 = vrot.slane %v995_v61, 2 }
 0x2d7   :  { %v997_v63 = vadd.f32 %v996_v62, %v995_v61 }
 0x2d9   :  { %v998_v1 = vrot.slane %v997_v63, 1 }
 0x2db   :  { %v999_v3 = vadd.f32 %v998_v1, %v997_v63 }
 0x2dd   :  { %v1000_v7 = vmul.f32 0.03125, %v999_v3 }
 0x2df   :  { %v1001_v8 = vsub.f32 %v983_v41, %v1000_v7  ;;  %v1002_v11 = vsub.f32 %v984_v42, %v1000_v7  ;;  %v1003_v12 = vsub.f32 %v985_v46, %v1000_v7  ;;  %v1004_v13 = vsub.f32 %v986_v0, %v1000_v7 }
 0x2e0   :  { %v1005_v15 = vsub.f32 %v987_v53, %v1000_v7  ;;  %v1006_v16 = vsub.f32 %v988_v57, %v1000_v7 }
 0x2e1   :  { %v1007_v17 = vmul.f32 %v1001_v8, %v1848_v2  ;;  %v1008_v20 = vmul.f32 %v1002_v11, %v1850_v4  ;;  %v1009_v22 = vmul.f32 %v1003_v12, %v1854_v14  ;;  %v1010_v23 = vmul.f32 %v1004_v13, %v1857_v19 }
 0x2e2   :  { %v1011_v27 = vmul.f32 %v1005_v15, %v1860_v25  ;;  %v1012_v31 = vmul.f32 %v1006_v16, %v1863_v29  ;;  %v1033_v25 = vld [vmem:[%s2013_s6] sm:$0x1]  ;;  %s1567_s6 = scalar_lea.vmem %s1077_s0, 512 }
 0x2e3   :  { %v1013_v24 = vmul.f32 %v1007_v17, %v1007_v17  ;;  %v1014_v26 = vmul.f32 %v1008_v20, %v1008_v20  ;;  %v1015_v28 = vmul.f32 %v1009_v22, %v1009_v22  ;;  %v1016_v32 = vmul.f32 %v1010_v23, %v1010_v23  ;;  %p1568_p8 = scmp.ne.s32.totalorder %s1077_s0, %s1567_s6  ;;  %p1573_p10 = scmp.lt.s32.totalorder %s1567_s6, %s1567_s6 }
 0x2e4   :  { %v1017_v34 = vmul.f32 %v1011_v27, %v1011_v27  ;;  %v1018_v36 = vmul.f32 %v1012_v31, %v1012_v31 }
 0x2e5   :  { %v1019_v30 = vadd.f32 %v1014_v26, %v1013_v24  ;;  %p1574_p11 = por %p1573_p10, %p1572_p9 }
 0x2e7   :  { %v1020_v33 = vadd.f32 %v1019_v30, %v1015_v28  ;;  %p1575_p12 = pnand %p1574_p11, %p1568_p8 }
 0x2e9   :  { %v1021_v35 = vadd.f32 %v1020_v33, %v1016_v32 }
 0x2eb   :  { %v1022_v2 = vadd.f32 %v1021_v35, %v1017_v34 }
 0x2ed   :  { %v1023_v37 = vadd.f32 %v1022_v2, %v1018_v36 }
 0x2ef   :  { %v1024_v4 = vrot.slane %v1023_v37, 4 }
 0x2f1   :  { %v1025_v38 = vadd.f32 %v1024_v4, %v1023_v37 }
 0x2f3   :  { %v1026_v14 = vrot.slane %v1025_v38, 2 }
 0x2f5   :  { %v1027_v39 = vadd.f32 %v1026_v14, %v1025_v38 }
 0x2f7   :  { %v1028_v19 = vrot.slane %v1027_v39, 1 }
 0x2f9   :  { %v1029_v40 = vadd.f32 %v1028_v19, %v1027_v39 }
 0x2fb   :  { %v1030_v41 = vmul.f32 0.03125, %v1029_v40 }
 0x2fd   :  { %v1031_v42 = vadd.f32 1e-05, %v1030_v41 }
 0x2ff   :  { %1543 = vrsqrt.f32 %v1031_v42 }
 0x309   :  { %v1544_v29 = vpop.eup %1543 }
 0x30a   :  { %v1034_v43 = vmul.f32 %v1544_v29, %v1033_v25 }
 0x30c   :  { %v1038_v44 = vrot.slane %v1034_v43, %v546_v21 }
 0x30e   :  { %v1042_v46 = vmul.f32 %v1038_v44, %v1012_v31  ;;  %v1039_v47 = vmul.f32 %v1038_v44, %v1007_v17  ;;  %v1040_v48 = vmul.f32 %v1038_v44, %v1008_v20  ;;  %v1041_v49 = vmul.f32 %v1038_v44, %v1011_v27 }
 0x310   :  { %v1053_v0 = vadd.f32 %v1201_v45, %v1042_v46  ;;  %v1050_v50 = vadd.f32 %v1201_v45, %v1039_v47  ;;  %v1051_v51 = vadd.f32 %v1201_v45, %v1040_v48  ;;  %v1052_v52 = vadd.f32 %v1201_v45, %v1041_v49 }
 0x312   :  { %v1057_v53 = vmax.f32 %v1053_v0, 0.0  ;;  %v1054_v54 = vmax.f32 %v1050_v50, 0.0  ;;  %v1055_v55 = vmax.f32 %v1051_v51, 0.0  ;;  %v1056_v56 = vmax.f32 %v1052_v52, 0.0 }
 0x314   :  { %v1060_v18 = vadd.f32 %v1054_v54, %v1682_v5  ;;  %v1061_v21 = vadd.f32 %v1055_v55, %v1684_v6  ;;  %v1066_v57 = vadd.f32 %v1056_v56, %v1695_v9  ;;  %v1067_v58 = vadd.f32 %v1057_v53, %v1698_v10 }
 0x316   :  { %1062 = vst [vmem:[#allocation6] sm:$0xff] %v1060_v18  ;;  %1063 = vst [vmem:[#allocation6 + $0x8] sm:$0xff] %v1061_v21 }
 0x317   :  { %1069 = vst [vmem:[#allocation6 + $0x10] sm:$0xff] %v1066_v57  ;;  %1070 = vst [vmem:[#allocation6 + $0x18] sm:$0xff] %v1067_v58 }
 0x318   :  { %1578 = shalt.err (!%p1575_p12)
}
 0x319   :  { %s1579_s20 = scalar_lea.hbm %s2015_s8, 512 }
 0x31a   :  { %p1580_p13 = scmp.ne.s32.totalorder %s2015_s8, %s1579_s20  ;;  %p1583_p0 = scmp.lt.u32.totalorder %s1579_s20, %s2015_s8 }
 0x31c   :  { %p1585_p1 = pnand %p1583_p0, %p1580_p13 }
 0x31e   :  { %1588 = shalt.err (!%p1585_p1)
}
 0x31f   :  { %1082 = dma.vmem_to_hbm [thread:$0]  %s1077_s0, 512, %s2015_s8, [#allocation5], %s1594_s15, %s1594_s15, %s1595_s16  }
 0x320   :  { %1591 = dma.done.wait [#allocation5], 512  }
 0x321   :  { %1592 = vsyncadd [#allocation5], 4294966784 }
 0x322   :  { %1086 = vsyncpa [#allocation4], 1 }
 0x323   :  { %1087 = vsyncpa [#allocation5], 1 }

</bundles_post_ra>
